<compile_context>
chip_gen: v7x
topology: tpu7x:2x2x1
jax: 0.10.0
libtpu: 0.0.40
codegen_flags: <defaults>
</compile_context>

<pallas_src>
import math

import jax
import jax.numpy as jnp
from jax import lax
from jax.experimental import pallas as pl
from jax.experimental.pallas import tpu as pltpu

NUM_HEADS = 4
MODEL_DIM = 32
HEAD_DIM = 8
TOTAL_DIM = NUM_HEADS * HEAD_DIM  # 32


def mha_kernel(q_ref, k_ref, v_ref,
               wq_ref, bq_ref, wk_ref, bk_ref, wv_ref, bv_ref, wo_ref, bo_ref,
               out_ref):
    bb, Sq, D = q_ref.shape
    _, Sk, _ = k_ref.shape

    # Linear projections over the whole chunk: (bb, S, D) x (D, total_dim)
    # -> (bb, S, total_dim).  One dot_general per projection, no reshapes.
    def proj(x, w_ref, b_ref):
        y = lax.dot_general(
            x, w_ref[...],
            dimension_numbers=(((2,), (0,)), ((), ())),
            preferred_element_type=jnp.float32)
        return y + b_ref[...]          # (1, total_dim) broadcasts over (bb, S, ·)

    Q = proj(q_ref[...], wq_ref, bq_ref)   # (bb, Sq, total_dim)
    K = proj(k_ref[...], wk_ref, bk_ref)   # (bb, Sk, total_dim)
    V = proj(v_ref[...], wv_ref, bv_ref)   # (bb, Sk, total_dim)

    scale = 1.0 / math.sqrt(HEAD_DIM)

    # Accumulate the output projection per head: no lane-axis concat of heads.
    acc = jnp.zeros((bb, Sq, D), dtype=jnp.float32)

    for h in range(NUM_HEADS):  # static unroll, NUM_HEADS is small
        lo = h * HEAD_DIM
        hi = lo + HEAD_DIM
        Qh = Q[:, :, lo:hi]                # (bb, Sq, head_dim)
        Kh = K[:, :, lo:hi]                # (bb, Sk, head_dim)
        Vh = V[:, :, lo:hi]                # (bb, Sk, head_dim)

        # scores[b, q, k] = sum_d Qh[b, q, d] * Kh[b, k, d]   (no explicit .T)
        scores = lax.dot_general(
            Qh, Kh,
            dimension_numbers=(((2,), (2,)), ((0,), (0,))),
            preferred_element_type=jnp.float32) * scale       # (bb, Sq, Sk)

        # Numerically-stable softmax along the key axis (torch.softmax dim=-1).
        m = jnp.max(scores, axis=-1, keepdims=True)
        e = jnp.exp(scores - m)
        denom = jnp.sum(e, axis=-1, keepdims=True)
        attn = e * pl.reciprocal(denom, approx=True)

        # ctx[b, q, d] = sum_k attn[b, q, k] * Vh[b, k, d]
        ctx = lax.dot_general(
            attn, Vh,
            dimension_numbers=(((2,), (1,)), ((0,), (0,))),
            preferred_element_type=jnp.float32)                # (bb, Sq, head_dim)

        # Per-head slice of the output projection weight (sublane-aligned rows).
        acc = acc + lax.dot_general(
            ctx, wo_ref[lo:hi, :],
            dimension_numbers=(((2,), (0,)), ((), ())),
            preferred_element_type=jnp.float32)                # (bb, Sq, D)

    out_ref[...] = (acc + bo_ref[...]).astype(out_ref.dtype)


def multi_head_attention(queries, keys, values, params, *, num_blocks=None):
    """queries: (B, Sq, model_dim); keys/values: (B, Sk, model_dim)."""
    B, Sq, D = queries.shape
    _, Sk, _ = keys.shape
    (wq, bq, wk, bk, wv, bv, wo, bo) = params

    # Default: 2 chunks when possible so v7x's two TensorCores both get work
    # (the axis is marked 'parallel'); otherwise one big chunk.
    if num_blocks is None:
        num_blocks = 2 if (B >= 2 and B % 2 == 0) else 1
    assert B % num_blocks == 0, "batch must divide evenly into blocks"
    bb = B // num_blocks

    # Constant block index -> weights/biases stay resident in VMEM across steps.
    w_spec = lambda shape: pl.BlockSpec(shape, lambda g: (0, 0))

    return pl.pallas_call(
        mha_kernel,
        out_shape=jax.ShapeDtypeStruct((B, Sq, D), queries.dtype),
        grid_spec=pltpu.PrefetchScalarGridSpec(
            num_scalar_prefetch=0,
            grid=(num_blocks,),
            in_specs=[
                pl.BlockSpec((bb, Sq, D), lambda g: (g, 0, 0)),
                pl.BlockSpec((bb, Sk, D), lambda g: (g, 0, 0)),
                pl.BlockSpec((bb, Sk, D), lambda g: (g, 0, 0)),
                w_spec(wq.shape), w_spec(bq.shape),
                w_spec(wk.shape), w_spec(bk.shape),
                w_spec(wv.shape), w_spec(bv.shape),
                w_spec(wo.shape), w_spec(bo.shape),
            ],
            out_specs=pl.BlockSpec((bb, Sq, D), lambda g: (g, 0, 0)),
        ),
        compiler_params=pltpu.CompilerParams(
            dimension_semantics=("parallel",)),
    )(queries, keys, values, wq, bq, wk, bk, wv, bv, wo, bo)


def reference_mha(queries, keys, values, params):
    """Pure-JAX reference mirroring the PyTorch forward."""
    (wq, bq, wk, bk, wv, bv, wo, bo) = params
    B, Sq, _ = queries.shape

    def proj(x, w, b):
        return x @ w + b[0]

    Q = proj(queries, wq, bq).reshape(B, -1, NUM_HEADS, HEAD_DIM).transpose(0, 2, 1, 3)
    K = proj(keys, wk, bk).reshape(B, -1, NUM_HEADS, HEAD_DIM).transpose(0, 2, 1, 3)
    V = proj(values, wv, bv).reshape(B, -1, NUM_HEADS, HEAD_DIM).transpose(0, 2, 1, 3)
    scores = jnp.einsum("bhqd,bhkd->bhqk", Q, K) / math.sqrt(HEAD_DIM)
    attn = jax.nn.softmax(scores, axis=-1)
    ctx = jnp.einsum("bhqk,bhkd->bhqd", attn, V)
    ctx = ctx.transpose(0, 2, 1, 3).reshape(B, Sq, TOTAL_DIM)
    return ctx @ wo + bo[0]


def make_params(key):
    ks = jax.random.split(key, 8)

    def lin(kw, kb, din, dout):
        bound = 1.0 / math.sqrt(din)
        w = jax.random.uniform(kw, (din, dout), jnp.float32, -bound, bound)
        b = jax.random.uniform(kb, (1, dout), jnp.float32, -bound, bound)
        return w, b

    wq, bq = lin(ks[0], ks[1], MODEL_DIM, TOTAL_DIM)
    wk, bk = lin(ks[2], ks[3], MODEL_DIM, TOTAL_DIM)
    wv, bv = lin(ks[4], ks[5], MODEL_DIM, TOTAL_DIM)
    wo, bo = lin(ks[6], ks[7], TOTAL_DIM, MODEL_DIM)
    return (wq, bq, wk, bk, wv, bv, wo, bo)


if __name__ == "__main__":
    key = jax.random.PRNGKey(0)
    k_params, kq, kk, kv = jax.random.split(key, 4)

    B, Sq, Sk = 4, 8, 8
    queries = jax.random.normal(kq, (B, Sq, MODEL_DIM), jnp.float32)
    keys = jax.random.normal(kk, (B, Sk, MODEL_DIM), jnp.float32)
    values = jax.random.normal(kv, (B, Sk, MODEL_DIM), jnp.float32)

    params = make_params(k_params)

    out = multi_head_attention(queries, keys, values, params)
    out = jax.block_until_ready(out)

    ref = reference_mha(queries, keys, values, params)
    assert out.shape == (B, Sq, MODEL_DIM)
    # approx=True reciprocal in the softmax denominator -> allow ~1e-3 slack.
    assert jnp.allclose(out, ref, atol=2e-3, rtol=2e-3), (
        float(jnp.max(jnp.abs(out - ref))))

    print("KERNEL_OK")
</pallas_src>

<mosaic_0001>
module attributes {stable_mosaic.version = 11 : i64} {
  func.func @mha_kernel(%arg0: i32, %arg1: memref<2x8x32xf32, #tpu.memory_space<vmem>>, %arg2: memref<2x8x32xf32, #tpu.memory_space<vmem>>, %arg3: memref<2x8x32xf32, #tpu.memory_space<vmem>>, %arg4: memref<32x32xf32, #tpu.memory_space<vmem>>, %arg5: memref<1x32xf32, #tpu.memory_space<vmem>>, %arg6: memref<32x32xf32, #tpu.memory_space<vmem>>, %arg7: memref<1x32xf32, #tpu.memory_space<vmem>>, %arg8: memref<32x32xf32, #tpu.memory_space<vmem>>, %arg9: memref<1x32xf32, #tpu.memory_space<vmem>>, %arg10: memref<32x32xf32, #tpu.memory_space<vmem>>, %arg11: memref<1x32xf32, #tpu.memory_space<vmem>>, %arg12: memref<2x8x32xf32, #tpu.memory_space<vmem>>) attributes {dimension_semantics = [#tpu.dimension_semantics<parallel>], iteration_bounds = array<i64: 2>, scalar_prefetch = 0 : i64, scratch_operands = 0 : i64, tpu.core_type = #tpu.core_type<tc>, window_params = [{transform_indices = @transform_0, window_bounds = array<i64: 2, 8, 32>}, {transform_indices = @transform_1, window_bounds = array<i64: 2, 8, 32>}, {transform_indices = @transform_2, window_bounds = array<i64: 2, 8, 32>}, {pipeline_mode = #tpu.pipeline_mode<synchronous>, transform_indices = @transform_3, window_bounds = array<i64: 32, 32>}, {pipeline_mode = #tpu.pipeline_mode<synchronous>, transform_indices = @transform_4, window_bounds = array<i64: 1, 32>}, {pipeline_mode = #tpu.pipeline_mode<synchronous>, transform_indices = @transform_5, window_bounds = array<i64: 32, 32>}, {pipeline_mode = #tpu.pipeline_mode<synchronous>, transform_indices = @transform_6, window_bounds = array<i64: 1, 32>}, {pipeline_mode = #tpu.pipeline_mode<synchronous>, transform_indices = @transform_7, window_bounds = array<i64: 32, 32>}, {pipeline_mode = #tpu.pipeline_mode<synchronous>, transform_indices = @transform_8, window_bounds = array<i64: 1, 32>}, {pipeline_mode = #tpu.pipeline_mode<synchronous>, transform_indices = @transform_9, window_bounds = array<i64: 32, 32>}, {pipeline_mode = #tpu.pipeline_mode<synchronous>, transform_indices = @transform_10, window_bounds = array<i64: 1, 32>}, {transform_indices = @transform_11, window_bounds = array<i64: 2, 8, 32>}]} {
    %c0 = arith.constant 0 : index
    %c0_0 = arith.constant 0 : index
    %c0_1 = arith.constant 0 : index
    %0 = vector.load %arg1[%c0, %c0_0, %c0_1] : memref<2x8x32xf32, #tpu.memory_space<vmem>>, vector<2x8x32xf32>
    %c0_2 = arith.constant 0 : index
    %c0_3 = arith.constant 0 : index
    %1 = vector.load %arg4[%c0_2, %c0_3] : memref<32x32xf32, #tpu.memory_space<vmem>>, vector<32x32xf32>
    %cst = arith.constant dense<0.000000e+00> : vector<2x8x32xf32>
    %2 = tpu.matmul %0, %1, %cst {dimension_numbers = #tpu.dot_dimension_numbers<[2], [0], [0, 1], [1], [0, 0, 0, 1, 1, 1], [], []>} : vector<2x8x32xf32>, vector<32x32xf32>, vector<2x8x32xf32> -> vector<2x8x32xf32>
    %c0_4 = arith.constant 0 : index
    %c0_5 = arith.constant 0 : index
    %3 = vector.load %arg5[%c0_4, %c0_5] : memref<1x32xf32, #tpu.memory_space<vmem>>, vector<1x32xf32>
    %4 = vector.shape_cast %3 : vector<1x32xf32> to vector<1x1x32xf32>
    %5 = vector.broadcast %4 : vector<1x1x32xf32> to vector<2x8x32xf32>
    %6 = arith.addf %2, %5 : vector<2x8x32xf32>
    %c0_6 = arith.constant 0 : index
    %c0_7 = arith.constant 0 : index
    %c0_8 = arith.constant 0 : index
    %7 = vector.load %arg2[%c0_6, %c0_7, %c0_8] : memref<2x8x32xf32, #tpu.memory_space<vmem>>, vector<2x8x32xf32>
    %c0_9 = arith.constant 0 : index
    %c0_10 = arith.constant 0 : index
    %8 = vector.load %arg6[%c0_9, %c0_10] : memref<32x32xf32, #tpu.memory_space<vmem>>, vector<32x32xf32>
    %cst_11 = arith.constant dense<0.000000e+00> : vector<2x8x32xf32>
    %9 = tpu.matmul %7, %8, %cst_11 {dimension_numbers = #tpu.dot_dimension_numbers<[2], [0], [0, 1], [1], [0, 0, 0, 1, 1, 1], [], []>} : vector<2x8x32xf32>, vector<32x32xf32>, vector<2x8x32xf32> -> vector<2x8x32xf32>
    %c0_12 = arith.constant 0 : index
    %c0_13 = arith.constant 0 : index
    %10 = vector.load %arg7[%c0_12, %c0_13] : memref<1x32xf32, #tpu.memory_space<vmem>>, vector<1x32xf32>
    %11 = vector.shape_cast %10 : vector<1x32xf32> to vector<1x1x32xf32>
    %12 = vector.broadcast %11 : vector<1x1x32xf32> to vector<2x8x32xf32>
    %13 = arith.addf %9, %12 : vector<2x8x32xf32>
    %c0_14 = arith.constant 0 : index
    %c0_15 = arith.constant 0 : index
    %c0_16 = arith.constant 0 : index
    %14 = vector.load %arg3[%c0_14, %c0_15, %c0_16] : memref<2x8x32xf32, #tpu.memory_space<vmem>>, vector<2x8x32xf32>
    %c0_17 = arith.constant 0 : index
    %c0_18 = arith.constant 0 : index
    %15 = vector.load %arg8[%c0_17, %c0_18] : memref<32x32xf32, #tpu.memory_space<vmem>>, vector<32x32xf32>
    %cst_19 = arith.constant dense<0.000000e+00> : vector<2x8x32xf32>
    %16 = tpu.matmul %14, %15, %cst_19 {dimension_numbers = #tpu.dot_dimension_numbers<[2], [0], [0, 1], [1], [0, 0, 0, 1, 1, 1], [], []>} : vector<2x8x32xf32>, vector<32x32xf32>, vector<2x8x32xf32> -> vector<2x8x32xf32>
    %c0_20 = arith.constant 0 : index
    %c0_21 = arith.constant 0 : index
    %17 = vector.load %arg9[%c0_20, %c0_21] : memref<1x32xf32, #tpu.memory_space<vmem>>, vector<1x32xf32>
    %18 = vector.shape_cast %17 : vector<1x32xf32> to vector<1x1x32xf32>
    %19 = vector.broadcast %18 : vector<1x1x32xf32> to vector<2x8x32xf32>
    %20 = arith.addf %16, %19 : vector<2x8x32xf32>
    %cst_22 = arith.constant 0.000000e+00 : f32
    %21 = vector.broadcast %cst_22 : f32 to vector<2x8x32xf32>
    %22 = vector.extract_strided_slice %6 {offsets = [0, 0, 0], sizes = [2, 8, 8], strides = [1, 1, 1]} : vector<2x8x32xf32> to vector<2x8x8xf32>
    %23 = vector.extract_strided_slice %13 {offsets = [0, 0, 0], sizes = [2, 8, 8], strides = [1, 1, 1]} : vector<2x8x32xf32> to vector<2x8x8xf32>
    %24 = vector.extract_strided_slice %20 {offsets = [0, 0, 0], sizes = [2, 8, 8], strides = [1, 1, 1]} : vector<2x8x32xf32> to vector<2x8x8xf32>
    %cst_23 = arith.constant dense<0.000000e+00> : vector<2x8x8xf32>
    %25 = tpu.matmul %22, %23, %cst_23 {dimension_numbers = #tpu.dot_dimension_numbers<[2], [2], [1], [1], [0, 0, 0, 1, 1, 1], [0], [0]>} : vector<2x8x8xf32>, vector<2x8x8xf32>, vector<2x8x8xf32> -> vector<2x8x8xf32>
    %cst_24 = arith.constant 0.353553385 : f32
    %26 = vector.broadcast %cst_24 : f32 to vector<2x8x8xf32>
    %27 = arith.mulf %25, %26 : vector<2x8x8xf32>
    %cst_25 = arith.constant dense<0xFF800000> : vector<2x8xf32>
    %28 = vector.multi_reduction <maximumf>, %27, %cst_25 [2] : vector<2x8x8xf32> to vector<2x8xf32>
    %29 = vector.shape_cast %28 : vector<2x8xf32> to vector<2x8x1xf32>
    %30 = vector.broadcast %29 : vector<2x8x1xf32> to vector<2x8x8xf32>
    %31 = arith.subf %27, %30 : vector<2x8x8xf32>
    %32 = math.exp %31 : vector<2x8x8xf32>
    %cst_26 = arith.constant dense<0.000000e+00> : vector<2x8xf32>
    %33 = vector.multi_reduction <add>, %32, %cst_26 [2] : vector<2x8x8xf32> to vector<2x8xf32>
    %34 = vector.shape_cast %33 : vector<2x8xf32> to vector<2x8x1xf32>
    %35 = tpu.reciprocal %34 {approx = true} : vector<2x8x1xf32> -> vector<2x8x1xf32>
    %36 = vector.broadcast %35 : vector<2x8x1xf32> to vector<2x8x8xf32>
    %37 = arith.mulf %32, %36 : vector<2x8x8xf32>
    %cst_27 = arith.constant dense<0.000000e+00> : vector<2x8x8xf32>
    %38 = tpu.matmul %37, %24, %cst_27 {dimension_numbers = #tpu.dot_dimension_numbers<[2], [1], [1], [2], [0, 0, 0, 1, 1, 2], [0], [0]>} : vector<2x8x8xf32>, vector<2x8x8xf32>, vector<2x8x8xf32> -> vector<2x8x8xf32>
    %c0_28 = arith.constant 0 : index
    %c0_29 = arith.constant 0 : index
    %39 = vector.load %arg10[%c0_28, %c0_29] : memref<32x32xf32, #tpu.memory_space<vmem>>, vector<8x32xf32>
    %cst_30 = arith.constant dense<0.000000e+00> : vector<2x8x32xf32>
    %40 = tpu.matmul %38, %39, %cst_30 {dimension_numbers = #tpu.dot_dimension_numbers<[2], [0], [0, 1], [1], [0, 0, 0, 1, 1, 1], [], []>} : vector<2x8x8xf32>, vector<8x32xf32>, vector<2x8x32xf32> -> vector<2x8x32xf32>
    %41 = arith.addf %21, %40 : vector<2x8x32xf32>
    %42 = vector.extract_strided_slice %6 {offsets = [0, 0, 8], sizes = [2, 8, 8], strides = [1, 1, 1]} : vector<2x8x32xf32> to vector<2x8x8xf32>
    %43 = vector.extract_strided_slice %13 {offsets = [0, 0, 8], sizes = [2, 8, 8], strides = [1, 1, 1]} : vector<2x8x32xf32> to vector<2x8x8xf32>
    %44 = vector.extract_strided_slice %20 {offsets = [0, 0, 8], sizes = [2, 8, 8], strides = [1, 1, 1]} : vector<2x8x32xf32> to vector<2x8x8xf32>
    %cst_31 = arith.constant dense<0.000000e+00> : vector<2x8x8xf32>
    %45 = tpu.matmul %42, %43, %cst_31 {dimension_numbers = #tpu.dot_dimension_numbers<[2], [2], [1], [1], [0, 0, 0, 1, 1, 1], [0], [0]>} : vector<2x8x8xf32>, vector<2x8x8xf32>, vector<2x8x8xf32> -> vector<2x8x8xf32>
    %cst_32 = arith.constant 0.353553385 : f32
    %46 = vector.broadcast %cst_32 : f32 to vector<2x8x8xf32>
    %47 = arith.mulf %45, %46 : vector<2x8x8xf32>
    %cst_33 = arith.constant dense<0xFF800000> : vector<2x8xf32>
    %48 = vector.multi_reduction <maximumf>, %47, %cst_33 [2] : vector<2x8x8xf32> to vector<2x8xf32>
    %49 = vector.shape_cast %48 : vector<2x8xf32> to vector<2x8x1xf32>
    %50 = vector.broadcast %49 : vector<2x8x1xf32> to vector<2x8x8xf32>
    %51 = arith.subf %47, %50 : vector<2x8x8xf32>
    %52 = math.exp %51 : vector<2x8x8xf32>
    %cst_34 = arith.constant dense<0.000000e+00> : vector<2x8xf32>
    %53 = vector.multi_reduction <add>, %52, %cst_34 [2] : vector<2x8x8xf32> to vector<2x8xf32>
    %54 = vector.shape_cast %53 : vector<2x8xf32> to vector<2x8x1xf32>
    %55 = tpu.reciprocal %54 {approx = true} : vector<2x8x1xf32> -> vector<2x8x1xf32>
    %56 = vector.broadcast %55 : vector<2x8x1xf32> to vector<2x8x8xf32>
    %57 = arith.mulf %52, %56 : vector<2x8x8xf32>
    %cst_35 = arith.constant dense<0.000000e+00> : vector<2x8x8xf32>
    %58 = tpu.matmul %57, %44, %cst_35 {dimension_numbers = #tpu.dot_dimension_numbers<[2], [1], [1], [2], [0, 0, 0, 1, 1, 2], [0], [0]>} : vector<2x8x8xf32>, vector<2x8x8xf32>, vector<2x8x8xf32> -> vector<2x8x8xf32>
    %c8 = arith.constant 8 : index
    %c0_36 = arith.constant 0 : index
    %59 = vector.load %arg10[%c8, %c0_36] : memref<32x32xf32, #tpu.memory_space<vmem>>, vector<8x32xf32>
    %cst_37 = arith.constant dense<0.000000e+00> : vector<2x8x32xf32>
    %60 = tpu.matmul %58, %59, %cst_37 {dimension_numbers = #tpu.dot_dimension_numbers<[2], [0], [0, 1], [1], [0, 0, 0, 1, 1, 1], [], []>} : vector<2x8x8xf32>, vector<8x32xf32>, vector<2x8x32xf32> -> vector<2x8x32xf32>
    %61 = arith.addf %41, %60 : vector<2x8x32xf32>
    %62 = vector.extract_strided_slice %6 {offsets = [0, 0, 16], sizes = [2, 8, 8], strides = [1, 1, 1]} : vector<2x8x32xf32> to vector<2x8x8xf32>
    %63 = vector.extract_strided_slice %13 {offsets = [0, 0, 16], sizes = [2, 8, 8], strides = [1, 1, 1]} : vector<2x8x32xf32> to vector<2x8x8xf32>
    %64 = vector.extract_strided_slice %20 {offsets = [0, 0, 16], sizes = [2, 8, 8], strides = [1, 1, 1]} : vector<2x8x32xf32> to vector<2x8x8xf32>
    %cst_38 = arith.constant dense<0.000000e+00> : vector<2x8x8xf32>
    %65 = tpu.matmul %62, %63, %cst_38 {dimension_numbers = #tpu.dot_dimension_numbers<[2], [2], [1], [1], [0, 0, 0, 1, 1, 1], [0], [0]>} : vector<2x8x8xf32>, vector<2x8x8xf32>, vector<2x8x8xf32> -> vector<2x8x8xf32>
    %cst_39 = arith.constant 0.353553385 : f32
    %66 = vector.broadcast %cst_39 : f32 to vector<2x8x8xf32>
    %67 = arith.mulf %65, %66 : vector<2x8x8xf32>
    %cst_40 = arith.constant dense<0xFF800000> : vector<2x8xf32>
    %68 = vector.multi_reduction <maximumf>, %67, %cst_40 [2] : vector<2x8x8xf32> to vector<2x8xf32>
    %69 = vector.shape_cast %68 : vector<2x8xf32> to vector<2x8x1xf32>
    %70 = vector.broadcast %69 : vector<2x8x1xf32> to vector<2x8x8xf32>
    %71 = arith.subf %67, %70 : vector<2x8x8xf32>
    %72 = math.exp %71 : vector<2x8x8xf32>
    %cst_41 = arith.constant dense<0.000000e+00> : vector<2x8xf32>
    %73 = vector.multi_reduction <add>, %72, %cst_41 [2] : vector<2x8x8xf32> to vector<2x8xf32>
    %74 = vector.shape_cast %73 : vector<2x8xf32> to vector<2x8x1xf32>
    %75 = tpu.reciprocal %74 {approx = true} : vector<2x8x1xf32> -> vector<2x8x1xf32>
    %76 = vector.broadcast %75 : vector<2x8x1xf32> to vector<2x8x8xf32>
    %77 = arith.mulf %72, %76 : vector<2x8x8xf32>
    %cst_42 = arith.constant dense<0.000000e+00> : vector<2x8x8xf32>
    %78 = tpu.matmul %77, %64, %cst_42 {dimension_numbers = #tpu.dot_dimension_numbers<[2], [1], [1], [2], [0, 0, 0, 1, 1, 2], [0], [0]>} : vector<2x8x8xf32>, vector<2x8x8xf32>, vector<2x8x8xf32> -> vector<2x8x8xf32>
    %c16 = arith.constant 16 : index
    %c0_43 = arith.constant 0 : index
    %79 = vector.load %arg10[%c16, %c0_43] : memref<32x32xf32, #tpu.memory_space<vmem>>, vector<8x32xf32>
    %cst_44 = arith.constant dense<0.000000e+00> : vector<2x8x32xf32>
    %80 = tpu.matmul %78, %79, %cst_44 {dimension_numbers = #tpu.dot_dimension_numbers<[2], [0], [0, 1], [1], [0, 0, 0, 1, 1, 1], [], []>} : vector<2x8x8xf32>, vector<8x32xf32>, vector<2x8x32xf32> -> vector<2x8x32xf32>
    %81 = arith.addf %61, %80 : vector<2x8x32xf32>
    %82 = vector.extract_strided_slice %6 {offsets = [0, 0, 24], sizes = [2, 8, 8], strides = [1, 1, 1]} : vector<2x8x32xf32> to vector<2x8x8xf32>
    %83 = vector.extract_strided_slice %13 {offsets = [0, 0, 24], sizes = [2, 8, 8], strides = [1, 1, 1]} : vector<2x8x32xf32> to vector<2x8x8xf32>
    %84 = vector.extract_strided_slice %20 {offsets = [0, 0, 24], sizes = [2, 8, 8], strides = [1, 1, 1]} : vector<2x8x32xf32> to vector<2x8x8xf32>
    %cst_45 = arith.constant dense<0.000000e+00> : vector<2x8x8xf32>
    %85 = tpu.matmul %82, %83, %cst_45 {dimension_numbers = #tpu.dot_dimension_numbers<[2], [2], [1], [1], [0, 0, 0, 1, 1, 1], [0], [0]>} : vector<2x8x8xf32>, vector<2x8x8xf32>, vector<2x8x8xf32> -> vector<2x8x8xf32>
    %cst_46 = arith.constant 0.353553385 : f32
    %86 = vector.broadcast %cst_46 : f32 to vector<2x8x8xf32>
    %87 = arith.mulf %85, %86 : vector<2x8x8xf32>
    %cst_47 = arith.constant dense<0xFF800000> : vector<2x8xf32>
    %88 = vector.multi_reduction <maximumf>, %87, %cst_47 [2] : vector<2x8x8xf32> to vector<2x8xf32>
    %89 = vector.shape_cast %88 : vector<2x8xf32> to vector<2x8x1xf32>
    %90 = vector.broadcast %89 : vector<2x8x1xf32> to vector<2x8x8xf32>
    %91 = arith.subf %87, %90 : vector<2x8x8xf32>
    %92 = math.exp %91 : vector<2x8x8xf32>
    %cst_48 = arith.constant dense<0.000000e+00> : vector<2x8xf32>
    %93 = vector.multi_reduction <add>, %92, %cst_48 [2] : vector<2x8x8xf32> to vector<2x8xf32>
    %94 = vector.shape_cast %93 : vector<2x8xf32> to vector<2x8x1xf32>
    %95 = tpu.reciprocal %94 {approx = true} : vector<2x8x1xf32> -> vector<2x8x1xf32>
    %96 = vector.broadcast %95 : vector<2x8x1xf32> to vector<2x8x8xf32>
    %97 = arith.mulf %92, %96 : vector<2x8x8xf32>
    %cst_49 = arith.constant dense<0.000000e+00> : vector<2x8x8xf32>
    %98 = tpu.matmul %97, %84, %cst_49 {dimension_numbers = #tpu.dot_dimension_numbers<[2], [1], [1], [2], [0, 0, 0, 1, 1, 2], [0], [0]>} : vector<2x8x8xf32>, vector<2x8x8xf32>, vector<2x8x8xf32> -> vector<2x8x8xf32>
    %c24 = arith.constant 24 : index
    %c0_50 = arith.constant 0 : index
    %99 = vector.load %arg10[%c24, %c0_50] : memref<32x32xf32, #tpu.memory_space<vmem>>, vector<8x32xf32>
    %cst_51 = arith.constant dense<0.000000e+00> : vector<2x8x32xf32>
    %100 = tpu.matmul %98, %99, %cst_51 {dimension_numbers = #tpu.dot_dimension_numbers<[2], [0], [0, 1], [1], [0, 0, 0, 1, 1, 1], [], []>} : vector<2x8x8xf32>, vector<8x32xf32>, vector<2x8x32xf32> -> vector<2x8x32xf32>
    %101 = arith.addf %81, %100 : vector<2x8x32xf32>
    %c0_52 = arith.constant 0 : index
    %c0_53 = arith.constant 0 : index
    %102 = vector.load %arg11[%c0_52, %c0_53] : memref<1x32xf32, #tpu.memory_space<vmem>>, vector<1x32xf32>
    %103 = vector.shape_cast %102 : vector<1x32xf32> to vector<1x1x32xf32>
    %104 = vector.broadcast %103 : vector<1x1x32xf32> to vector<2x8x32xf32>
    %105 = arith.addf %101, %104 : vector<2x8x32xf32>
    %c0_54 = arith.constant 0 : index
    %c0_55 = arith.constant 0 : index
    %c0_56 = arith.constant 0 : index
    %106 = vector.load %arg12[%c0_54, %c0_55, %c0_56] : memref<2x8x32xf32, #tpu.memory_space<vmem>>, vector<2x8x32xf32>
    tpu.vector_store %arg12[%c0_54, %c0_55, %c0_56], %105 {strides = array<i32>} : memref<2x8x32xf32, #tpu.memory_space<vmem>>, vector<2x8x32xf32>,
    return
  }
  func.func @transform_0(%arg0: i32) -> (i32, i32, i32) {
    %c0_i32 = arith.constant 0 : i32
    %c0_i32_0 = arith.constant 0 : i32
    %c0_i32_1 = arith.constant 0 : i32
    return %arg0, %c0_i32, %c0_i32_0 : i32, i32, i32
  }
  func.func @transform_1(%arg0: i32) -> (i32, i32, i32) {
    %c0_i32 = arith.constant 0 : i32
    %c0_i32_0 = arith.constant 0 : i32
    %c0_i32_1 = arith.constant 0 : i32
    return %arg0, %c0_i32, %c0_i32_0 : i32, i32, i32
  }
  func.func @transform_2(%arg0: i32) -> (i32, i32, i32) {
    %c0_i32 = arith.constant 0 : i32
    %c0_i32_0 = arith.constant 0 : i32
    %c0_i32_1 = arith.constant 0 : i32
    return %arg0, %c0_i32, %c0_i32_0 : i32, i32, i32
  }
  func.func @transform_3(%arg0: i32) -> (i32, i32) {
    %c0_i32 = arith.constant 0 : i32
    %c0_i32_0 = arith.constant 0 : i32
    %c0_i32_1 = arith.constant 0 : i32
    return %c0_i32, %c0_i32_0 : i32, i32
  }
  func.func @transform_4(%arg0: i32) -> (i32, i32) {
    %c0_i32 = arith.constant 0 : i32
    %c0_i32_0 = arith.constant 0 : i32
    %c0_i32_1 = arith.constant 0 : i32
    return %c0_i32, %c0_i32_0 : i32, i32
  }
  func.func @transform_5(%arg0: i32) -> (i32, i32) {
    %c0_i32 = arith.constant 0 : i32
    %c0_i32_0 = arith.constant 0 : i32
    %c0_i32_1 = arith.constant 0 : i32
    return %c0_i32, %c0_i32_0 : i32, i32
  }
  func.func @transform_6(%arg0: i32) -> (i32, i32) {
    %c0_i32 = arith.constant 0 : i32
    %c0_i32_0 = arith.constant 0 : i32
    %c0_i32_1 = arith.constant 0 : i32
    return %c0_i32, %c0_i32_0 : i32, i32
  }
  func.func @transform_7(%arg0: i32) -> (i32, i32) {
    %c0_i32 = arith.constant 0 : i32
    %c0_i32_0 = arith.constant 0 : i32
    %c0_i32_1 = arith.constant 0 : i32
    return %c0_i32, %c0_i32_0 : i32, i32
  }
  func.func @transform_8(%arg0: i32) -> (i32, i32) {
    %c0_i32 = arith.constant 0 : i32
    %c0_i32_0 = arith.constant 0 : i32
    %c0_i32_1 = arith.constant 0 : i32
    return %c0_i32, %c0_i32_0 : i32, i32
  }
  func.func @transform_9(%arg0: i32) -> (i32, i32) {
    %c0_i32 = arith.constant 0 : i32
    %c0_i32_0 = arith.constant 0 : i32
    %c0_i32_1 = arith.constant 0 : i32
    return %c0_i32, %c0_i32_0 : i32, i32
  }
  func.func @transform_10(%arg0: i32) -> (i32, i32) {
    %c0_i32 = arith.constant 0 : i32
    %c0_i32_0 = arith.constant 0 : i32
    %c0_i32_1 = arith.constant 0 : i32
    return %c0_i32, %c0_i32_0 : i32, i32
  }
  func.func @transform_11(%arg0: i32) -> (i32, i32, i32) {
    %c0_i32 = arith.constant 0 : i32
    %c0_i32_0 = arith.constant 0 : i32
    %c0_i32_1 = arith.constant 0 : i32
    return %arg0, %c0_i32, %c0_i32_0 : i32, i32, i32
  }
}

</mosaic_0001>

<bundles_post_ra>
// kernel: tpu_custom_call.1
= control target key start
LH: loop header
LB: loop body
LE: loop exit
PB: predicated region body
PF: predicated region fallthrough
CT: control target
= control target key end

     0   :  { %s4035_s0 = inlined_call_operand.hbm [shape: f32[4,8,32], index: 0, kind: input, shape index: {}]   ;;  %s4036_s1 = inlined_call_operand.hbm [shape: f32[4,8,32], index: 1, kind: input, shape index: {}]   ;;  %s4037_s2 = inlined_call_operand.hbm [shape: f32[4,8,32], index: 2, kind: input, shape index: {}]   ;;  %s4038_s3 = inlined_call_operand.hbm [shape: f32[32,32], index: 3, kind: input, shape index: {}]   ;;  %s4039_s4 = inlined_call_operand.vmem [shape: f32[1,32], index: 4, kind: input, shape index: {}]   ;;  %s4040_s5 = inlined_call_operand.hbm [shape: f32[32,32], index: 5, kind: input, shape index: {}]   ;;  %s4041_s6 = inlined_call_operand.vmem [shape: f32[1,32], index: 6, kind: input, shape index: {}]   ;;  %s4042_s7 = inlined_call_operand.hbm [shape: f32[32,32], index: 7, kind: input, shape index: {}]   ;;  %s4043_s8 = inlined_call_operand.hbm [shape: f32[1,32], index: 8, kind: input, shape index: {}]   ;;  %s4044_s9 = inlined_call_operand.vmem [shape: f32[32,32], index: 9, kind: input, shape index: {}]   ;;  %s4045_s10 = inlined_call_operand.vmem [shape: f32[1,32], index: 10, kind: input, shape index: {}]   ;;  %s4046_s11 = inlined_call_operand.hbm [shape: f32[4,8,32], index: 11, kind: output, shape index: {}]  }
   0x1   :  { %4073 = sst [smem:[#allocation26_spill]] %s4036_s1 }
   0x2   :  { %4074 = sst [smem:[#allocation27_spill]] %s4038_s3 }
   0x3   :  { %4075 = sst [smem:[#allocation28_spill]] %s4039_s4 }
   0x4   :  { %4076 = sst [smem:[#allocation29_spill]] %s4042_s7 }
   0x5   :  { %4077 = sst [smem:[#allocation30_spill]] %s4044_s9 }
   0x6   :  { %4078 = sst [smem:[#allocation31_spill]] %s4045_s10 }
   0x7   :  { %4079 = sst [smem:[#allocation32_spill]] %s4046_s11 }
   0x8   :  { %16 = vsyncpa [#allocation3], 0 }
   0x9   :  { %18 = vsyncpa [#allocation3 + $0x1], 0 }
   0xa   :  { %19 = vsyncpa [#allocation6], 0 }
   0xb   :  { %21 = vsyncpa [#allocation6 + $0x1], 0 }
   0xc   :  { %22 = vsyncpa [#allocation9], 0 }
   0xd   :  { %23 = vsyncpa [#allocation12], 0 }
   0xe   :  { %24 = vsyncpa [#allocation4], 0 }
   0xf   :  { %26 = vsyncpa [#allocation4 + $0x1], 0  ;;  %s3455_s17 = smov 0   ;;  %s3457_s18 = smov 0  }
  0x10   :  { %s3459_s19 = smov 0   ;;  %s3461_s20 = smov 0  }
  0x11 LB: > { %4080 = sst [smem:[#allocation20_spill]] %s3364_s17  ;;  %s3476_s21 = sadd.s32 4294967295, %s3376_s20   ;;  %s3376_s20 = sphi %s3461_s20, %s4122_s20   ;;  %s3372_s19 = sphi %s3459_s19, %s4126_s19   ;;  %s3368_s18 = sphi %s3457_s18, %s4125_s18   ;;  %s3364_s17 = sphi %s3455_s17, %s4124_s17  }
  0x12   : > { %4081 = sst [smem:[#allocation21_spill]] %s3376_s20  ;;  %s2657_s22 = sadd.s32 4294967294, %s3376_s20  }
  0x13   : > { %p52_p0 = scmp.ne.s32.totalorder %s3368_s18, %s3364_s17  ;;  %p4047_p1 = scmp.eq.s32.totalorder %s3476_s21, 0 }
  0x14   : > { %p302_p3 = scmp.eq.s32.totalorder %s2657_s22, 1  ;;  %p2658_p5 = scmp.ge.s32.totalorder %s3376_s20, 1 }
  0x15   : > { %p3485_p4 = por %p4047_p1, %p52_p0  ;;  %p309_p7 = scmp.lt.s32.totalorder %s3376_s20, 3 }
  0x16   : > { %p3490_p6 = por %p302_p3, %p52_p0  ;;  %s3378_s26 = smov [#allocation8]  }
  0x17   : > { %s4082_s23 = scalar_select %p3485_p4, 1, 0 }
  0x18   : > { %s4083_s24 = scalar_select %p3490_p6, 1, 0 }
  0x19   : > { %p3495_p8 = pnand %p2658_p5, %p309_p7  ;;  %s321_s27 = sshll.u32 %s3378_s26, 4  ;;  %s3499_s27 = int_to_ptr.vmem [resolvable:$true] %s321_s27 }
  0x1a   : > { %4084 = sst [smem:[#allocation22_spill]] %s4083_s24  ;;  %s3379_s29 = smov [#allocation11]  }
  0x1b   : > { %s4085_s25 = scalar_select %p3495_p8, 1, 0 }
  0x1c   : > { %p2982_p9 = pneg %p3495_p8  ;;  %s353_s30 = sshll.u32 %s3379_s29, 4  ;;  %s3510_s30 = int_to_ptr.vmem [resolvable:$true] %s353_s30 }
  0x1d   : > { %s4087_s3 = sld [smem:[#allocation27_spill]] }
  0x1e   : > { %p3506_p11 = pnand %p2982_p9, %p4047_p1 }
  0x20   : > { %s4086_s28 = scalar_select %p3506_p11, 1, 0 }
  0x21   : > { %p3520_p13 = pneg %p3506_p11 }
  0x23   : > { %s3096_s14 = scalar_lea.hbm %s4087_s3, 512 }
  0x24   : > { %p3097_p12 = scmp.ne.s32.totalorder %s4087_s3, %s3096_s14  ;;  %p3103_p5 = scmp.lt.u32.totalorder %s3096_s14, %s4087_s3 }
  0x25   : > { %s4088_s22 = scalar_select %p3520_p13, 1, 0 }
  0x26   : > { %p3099_p0 = pnand %p3520_p13, %p3097_p12 }
  0x28   : > { %p3100_p3 = pneg %p3099_p0 }
  0x2a   : > { %p3105_p7 = pnand %p3103_p5, %p3100_p3 }
  0x2c   : > { %3108 = shalt.err (!%p3105_p7)
}
  0x2d   : > { %s3109_s12 = scalar_lea.vmem %s3499_s27, 512  ;;  %p3117_p2 = scmp.lt.s32.totalorder %s3499_s27, %s3499_s27 }
  0x2e   : > { %p3110_p9 = scmp.ne.s32.totalorder %s3499_s27, %s3109_s12  ;;  %p3118_p6 = scmp.lt.s32.totalorder %s3109_s12, %s3109_s12 }
  0x30   : > { %p3112_p10 = pnand %p3110_p9, %p3520_p13  ;;  %p3119_p12 = por %p3118_p6, %p3117_p2 }
  0x32   : > { %p3113_p1 = pneg %p3112_p10 }
  0x34   : > { %p3120_p0 = pnand %p3119_p12, %p3113_p1 }
  0x36   : > { %3123 = shalt.err (!%p3120_p0)
}
  0x37   : > { %s4052_s13 = smov 128   ;;  %s4054_s14 = smov 8  }
  0x38   : > { %2985 = dma.hbm_to_vmem [thread:$0]  (!%p3506_p11), %s4087_s3, 512, %s3499_s27, [#allocation9], %s4052_s13, %s4052_s13, %s4054_s14  }
  0x39   : > { %s4089_s7 = sld [smem:[#allocation29_spill]] }
  0x3f   : > { %s3124_s12 = scalar_lea.hbm %s4089_s7, 512 }
  0x40   : > { %p3125_p1 = scmp.ne.s32.totalorder %s4089_s7, %s3124_s12  ;;  %p3131_p10 = scmp.lt.u32.totalorder %s3124_s12, %s4089_s7 }
  0x42   : > { %p3127_p2 = pnand %p3125_p1, %p3520_p13 }
  0x44   : > { %p3128_p6 = pneg %p3127_p2 }
  0x46   : > { %p3133_p3 = pnand %p3131_p10, %p3128_p6 }
  0x48   : > { %3136 = shalt.err (!%p3133_p3)
}
  0x49   : > { %s3137_s27 = scalar_lea.vmem %s3510_s30, 512  ;;  %p3145_p12 = scmp.lt.s32.totalorder %s3510_s30, %s3510_s30 }
  0x4a   : > { %p3138_p5 = scmp.ne.s32.totalorder %s3510_s30, %s3137_s27  ;;  %p3146_p0 = scmp.lt.s32.totalorder %s3137_s27, %s3137_s27 }
  0x4c   : > { %p3140_p7 = pnand %p3138_p5, %p3520_p13  ;;  %p3147_p1 = por %p3146_p0, %p3145_p12 }
  0x4e   : > { %p3141_p9 = pneg %p3140_p7 }
  0x50   : > { %p3148_p2 = pnand %p3147_p1, %p3141_p9 }
  0x52   : > { %3151 = shalt.err (!%p3148_p2)
}
  0x53   : > { %2991 = dma.hbm_to_vmem [thread:$0]  (!%p3506_p11), %s4089_s7, 512, %s3510_s30, [#allocation12], %s4052_s13, %s4052_s13, %s4054_s14  }
  0x54   : > { %s3571_s17 = sadd.s32 1, %s3376_s20   ;;  %s39_s24 = sadd.s32 1, %s3372_s19 }
  0x55   : > { %4090 = sst [smem:[#allocation23_spill]] %s3571_s17  ;;  %s36_s15 = ssub.s32 %s3376_s20, %s3571_s17 }
  0x56   : > { %p46_p6 = scmp.ne.s32.totalorder %s3372_s19, %s3368_s18  ;;  %p37_p10 = scmp.eq.s32.totalorder %s36_s15, 0 }
  0x57   : > { %p47_p3 = scmp.eq.s32.totalorder %s3376_s20, 0  ;;  %p4091_p5 = scmp.eq.s32.totalorder %s3476_s21, 1 }
  0x58   : > { %p3013_p9 = scmp.lt.s32.totalorder %s3376_s20, 2  ;;  %s4051_s29 = sand.u32 1, %s3372_s19  }
  0x59   : > { %p3581_p7 = por %p4091_p5, %p46_p6  ;;  %p48_p12 = por %p47_p3, %p46_p6 }
  0x5a   : > { %s3587_s26 = scalar_select %p37_p10, %s3372_s19, %s39_s24  }
  0x5b   : > { %s4092_s16 = scalar_select %p3581_p7, 1, 0 }
  0x5c   : > { %4094 = sst [smem:[#allocation25_spill]] %s3587_s26  ;;  %s3592_s30 = sshll.u32 %s4051_s29, 4 }
  0x5d   : > { %4093 = sst [smem:[#allocation24_spill]] %s4092_s16  ;;  %s3595_s12 = sshll.u32 %s3376_s20, 8 }
  0x5e   : > { %p3597_p0 = pnand %p3013_p9, %p48_p12  ;;  %s405_s10 = sand.u32 1, %s3376_s20  }
  0x5f   : > { %s4096_s1 = sld [smem:[#allocation26_spill]]  ;;  %s409_s29 = scalar_lea.vmem [#allocation5], %s3592_s30 }
  0x60   : > { %s4095_s27 = scalar_select %p3597_p0, 1, 0 }
  0x61   : > { %s416_s13 = sshll.u32 %s409_s29, 4  ;;  %s3382_s14 = smov [#allocation10]   ;;  %s3609_s13 = int_to_ptr.vmem [resolvable:$true] %s416_s13 }
  0x62   : > { %s3611_s3 = sshll.u32 %s3382_s14, 4  ;;  %s3613_s7 = scalar_lea.sflag [#allocation6], %s405_s10  ;;  %s338_s3 = int_to_ptr.vmem [resolvable:$true] %s3611_s3 }
  0x63   : > { %p3619_p2 = pneg %p3597_p0 }
  0x65   : > { %s3606_s24 = scalar_lea.hbm %s4096_s1, %s3595_s12  ;;  %s3157_s17 = scalar_lea.hbm %s4096_s1, 512 }
  0x66   : > { %s3152_s26 = scalar_lea.hbm %s3606_s24, 256  ;;  %p3158_p3 = scmp.lt.u32.totalorder %s3606_s24, %s4096_s1 }
  0x67   : > { %p3153_p1 = scmp.ne.s32.totalorder %s3606_s24, %s3152_s26  ;;  %p3159_p5 = scmp.lt.u32.totalorder %s3157_s17, %s3152_s26 }
  0x68   : > { %s4097_s11 = scalar_select %p3619_p2, 1, 0 }
  0x69   : > { %p3155_p6 = pnand %p3619_p2, %p3153_p1  ;;  %p3160_p9 = por %p3159_p5, %p3158_p3 }
  0x6a   : > { %p3161_p12 = scmp.lt.u32.totalorder %s3152_s26, %s3606_s24 }
  0x6b   : > { %p3156_p10 = pneg %p3155_p6 }
  0x6c   : > { %p3162_p7 = por %p3161_p12, %p3160_p9 }
  0x6e   : > { %p3163_p4 = pnand %p3162_p7, %p3156_p10 }
  0x70   : > { %3166 = shalt.err (!%p3163_p4)
}
  0x71   : > { %s3167_s10 = scalar_lea.vmem %s3609_s13, 256  ;;  %s3383_s15 = smov [#allocation5]  }
  0x72   : > { %p3168_p1 = scmp.ne.s32.totalorder %s3609_s13, %s3167_s10  ;;  %s3172_s29 = sshll.u32 %s3383_s15, 4  ;;  %s3173_s29 = int_to_ptr.vmem [resolvable:$false] %s3172_s29 }
  0x73   : > { %s3174_s20 = scalar_lea.vmem %s3173_s29, 512  ;;  %p3175_p11 = scmp.lt.s32.totalorder %s3609_s13, %s3173_s29 }
  0x74   : > { %p3170_p6 = pnand %p3168_p1, %p3619_p2  ;;  %p3176_p13 = scmp.lt.s32.totalorder %s3174_s20, %s3167_s10 }
  0x76   : > { %p3171_p8 = pneg %p3170_p6  ;;  %p3177_p3 = por %p3176_p13, %p3175_p11 }
  0x78   : > { %p3178_p5 = pnand %p3177_p3, %p3171_p8 }
  0x7a   : > { %3181 = shalt.err (!%p3178_p5)
}
  0x7b   : > { %s4098_s17 = smov 8   ;;  %s4099_s26 = smov 128  }
  0x7c   : > { %3001 = dma.hbm_to_vmem [thread:$0]  (!%p3597_p0), %s3606_s24, 256, %s3609_s13, %s3613_s7, %s4099_s26, %s4099_s26, %s4098_s17  }
  0x7d   : > { %s3182_s29 = scalar_lea.hbm %s4040_s5, 512  ;;  %p4100_p8 = scmp.ne.s32.totalorder %s4088_s22, 0 }
  0x7e   : > { %p3183_p4 = scmp.ne.s32.totalorder %s4040_s5, %s3182_s29  ;;  %p3189_p7 = scmp.lt.u32.totalorder %s3182_s29, %s4040_s5 }
  0x80   : > { %p3185_p11 = pnand %p3183_p4, %p4100_p8 }
  0x82   : > { %p3186_p13 = pneg %p3185_p11 }
  0x84   : > { %p3191_p10 = pnand %p3189_p7, %p3186_p13 }
  0x86   : > { %3194 = shalt.err (!%p3191_p10)
}
  0x87   : > { %s3195_s9 = scalar_lea.vmem %s338_s3, 512  ;;  %p3203_p6 = scmp.lt.s32.totalorder %s338_s3, %s338_s3 }
  0x88   : > { %p3196_p9 = scmp.ne.s32.totalorder %s338_s3, %s3195_s9  ;;  %p3204_p3 = scmp.lt.s32.totalorder %s3195_s9, %s3195_s9 }
  0x8a   : > { %p3198_p12 = pnand %p3196_p9, %p4100_p8  ;;  %p3205_p5 = por %p3204_p3, %p3203_p6 }
  0x8c   : > { %p3199_p1 = pneg %p3198_p12 }
  0x8e   : > { %p3206_p0 = pnand %p3205_p5, %p3199_p1 }
  0x90   : > { %3209 = shalt.err (!%p3206_p0)
}
  0x91   : > { %p4101_p4 = scmp.ne.s32.totalorder %s4086_s28, 0  ;;  %s3384_s16 = smov [#allocation13]  }
  0x92   : > { %s367_s24 = sshll.u32 %s3384_s16, 4  ;;  %s3210_s9 = scalar_lea.hbm %s4043_s8, 16  ;;  %s368_s24 = int_to_ptr.vmem [resolvable:$true] %s367_s24 }
  0x93   : > { %2988 = dma.hbm_to_vmem [thread:$0]  (!%p4101_p4), %s4040_s5, 512, %s338_s3, [#allocation9], %s4099_s26, %s4099_s26, %s4098_s17  }
  0x94   : > { %p3211_p0 = scmp.ne.s32.totalorder %s4043_s8, %s3210_s9  ;;  %p3217_p7 = scmp.lt.u32.totalorder %s3210_s9, %s4043_s8 }
  0x96   : > { %p3213_p11 = pnand %p3211_p0, %p4100_p8 }
  0x98   : > { %p3214_p13 = pneg %p3213_p11 }
  0x9a   : > { %p3219_p10 = pnand %p3217_p7, %p3214_p13 }
  0x9c   : > { %3222 = shalt.err (!%p3219_p10)
}
  0x9d   : > { %s3223_s3 = scalar_lea.vmem %s368_s24, 16  ;;  %s3230_s1 = scalar_lea.vmem %s368_s24, 32 }
  0x9e   : > { %p3224_p9 = scmp.ne.s32.totalorder %s368_s24, %s3223_s3  ;;  %p3231_p6 = scmp.lt.s32.totalorder %s368_s24, %s368_s24 }
  0x9f   : > { %p3232_p3 = scmp.lt.s32.totalorder %s3230_s1, %s3223_s3 }
  0xa0   : > { %p3226_p12 = pnand %p3224_p9, %p4100_p8 }
  0xa1   : > { %p3233_p5 = por %p3232_p3, %p3231_p6 }
  0xa2   : > { %p3227_p1 = pneg %p3226_p12 }
  0xa4   : > { %p3234_p2 = pnand %p3233_p5, %p3227_p1 }
  0xa6   : > { %3237 = shalt.err (!%p3234_p2)
}
  0xa7   : > { %2994 = dma.hbm_to_vmem [thread:$0]  (!%p4101_p4), %s4043_s8, 16, %s368_s24, [#allocation12]  }
  0xa8   : > { %s3690_s14 = scalar_lea.hbm %s4035_s0, %s3595_s12  ;;  %s388_s15 = scalar_lea.vmem [#allocation2], %s3592_s30 }
  0xa9   : > { %s395_s9 = sshll.u32 %s388_s15, 4  ;;  %s4102_s28 = sand.u32 1, %s3372_s19   ;;  %s3693_s9 = int_to_ptr.vmem [resolvable:$true] %s395_s9 }
  0xaa   : > { %s3697_s29 = scalar_lea.sflag [#allocation3], %s4102_s28  ;;  %s3238_s10 = scalar_lea.hbm %s3690_s14, 256 }
  0xab   : > { %p3239_p2 = scmp.ne.s32.totalorder %s3690_s14, %s3238_s10  ;;  %p4103_p8 = scmp.ne.s32.totalorder %s4097_s11, 0 }
  0xac   : > { %s3243_s3 = scalar_lea.hbm %s4035_s0, 512  ;;  %p3244_p11 = scmp.lt.u32.totalorder %s3690_s14, %s4035_s0 }
  0xad   : > { %p3241_p4 = pnand %p3239_p2, %p4103_p8  ;;  %p3245_p13 = scmp.lt.u32.totalorder %s3243_s3, %s3238_s10 }
  0xae   : > { %p3247_p10 = scmp.lt.u32.totalorder %s3238_s10, %s3690_s14 }
  0xaf   : > { %p3242_p0 = pneg %p3241_p4  ;;  %p3246_p7 = por %p3245_p13, %p3244_p11 }
  0xb1   : > { %p3248_p9 = por %p3247_p10, %p3246_p7 }
  0xb3   : > { %p3249_p12 = pnand %p3248_p9, %p3242_p0 }
  0xb5   : > { %3252 = shalt.err (!%p3249_p12)
}
  0xb6   : > { %s3253_s16 = scalar_lea.vmem %s3693_s9, 256  ;;  %s3385_s4 = smov [#allocation2]  }
  0xb7   : > { %p3254_p1 = scmp.ne.s32.totalorder %s3693_s9, %s3253_s16  ;;  %s3258_s22 = sshll.u32 %s3385_s4, 4  ;;  %s3259_s22 = int_to_ptr.vmem [resolvable:$false] %s3258_s22 }
  0xb8   : > { %s3260_s15 = scalar_lea.vmem %s3259_s22, 512  ;;  %p3261_p5 = scmp.lt.s32.totalorder %s3693_s9, %s3259_s22 }
  0xb9   : > { %p3256_p6 = pnand %p3254_p1, %p4103_p8  ;;  %p3262_p2 = scmp.lt.s32.totalorder %s3260_s15, %s3253_s16 }
  0xbb   : > { %p3257_p3 = pneg %p3256_p6  ;;  %p3263_p4 = por %p3262_p2, %p3261_p5 }
  0xbd   : > { %p3264_p11 = pnand %p3263_p4, %p3257_p3 }
  0xbf   : > { %3267 = shalt.err (!%p3264_p11)
}
  0xc0   : > { %p4104_p0 = scmp.ne.s32.totalorder %s4095_s27, 0  ;;  %s3728_s24 = scalar_lea.hbm %s4037_s2, %s3595_s12 }
  0xc1   : > { %s430_s20 = scalar_lea.vmem [#allocation7], %s3592_s30  ;;  %s3268_s1 = scalar_lea.hbm %s3728_s24, 256 }
  0xc2   : > { %2998 = dma.hbm_to_vmem [thread:$0]  (!%p4104_p0), %s3690_s14, 256, %s3693_s9, %s3697_s29, %s4099_s26, %s4099_s26, %s4098_s17  }
  0xc3   : > { %s437_s3 = sshll.u32 %s430_s20, 4  ;;  %p3269_p13 = scmp.ne.s32.totalorder %s3728_s24, %s3268_s1  ;;  %s3731_s3 = int_to_ptr.vmem [resolvable:$true] %s437_s3 }
  0xc4   : > { %s3273_s9 = scalar_lea.hbm %s4037_s2, 512  ;;  %p3274_p9 = scmp.lt.u32.totalorder %s3728_s24, %s4037_s2 }
  0xc5   : > { %p3271_p7 = pnand %p3269_p13, %p4103_p8  ;;  %p3275_p12 = scmp.lt.u32.totalorder %s3273_s9, %s3268_s1 }
  0xc6   : > { %p3277_p6 = scmp.lt.u32.totalorder %s3268_s1, %s3728_s24 }
  0xc7   : > { %p3272_p10 = pneg %p3271_p7  ;;  %p3276_p1 = por %p3275_p12, %p3274_p9 }
  0xc9   : > { %p3278_p3 = por %p3277_p6, %p3276_p1 }
  0xcb   : > { %p3279_p5 = pnand %p3278_p3, %p3272_p10 }
  0xcd   : > { %3282 = shalt.err (!%p3279_p5)
}
  0xce   : > { %s3283_s30 = scalar_lea.vmem %s3731_s3, 256  ;;  %s3386_s16 = smov [#allocation7]  }
  0xcf   : > { %p3284_p2 = scmp.ne.s32.totalorder %s3731_s3, %s3283_s30  ;;  %s3288_s4 = sshll.u32 %s3386_s16, 4  ;;  %s3289_s4 = int_to_ptr.vmem [resolvable:$false] %s3288_s4 }
  0xd0   : > { %s3290_s22 = scalar_lea.vmem %s3289_s4, 512  ;;  %p3291_p13 = scmp.lt.s32.totalorder %s3731_s3, %s3289_s4 }
  0xd1   : > { %p3286_p4 = pnand %p3284_p2, %p4103_p8  ;;  %p3292_p7 = scmp.lt.s32.totalorder %s3290_s22, %s3283_s30 }
  0xd3   : > { %p3287_p11 = pneg %p3286_p4  ;;  %p3293_p9 = por %p3292_p7, %p3291_p13 }
  0xd5   : > { %p3294_p12 = pnand %p3293_p9, %p3287_p11 }
  0xd7   : > { %3297 = shalt.err (!%p3294_p12)
}
  0xd8   : > { %3004 = dma.hbm_to_vmem [thread:$0]  (!%p4104_p0), %s3728_s24, 256, %s3731_s3, %s3613_s7, %s4099_s26, %s4099_s26, %s4098_s17  }
  0xd9   : > { %p4105_p8 = scmp.ne.s32.totalorder %s4085_s25, 0 }
  0xda   : > { %s3761_s11 = sand.u32 (!%p4105_p8), 1, %s3368_s18   ;;  %p4106_p10 = scmp.ne.s32.totalorder (!%p4105_p8), %s4082_s23, 0 }
  0xdb   : > { %449 = sbr.rel (%p4105_p8) target bundleno = 3254 (0xcb6), region = 64  ;;  %s3764_s15 = sshll.u32 (!%p4105_p8), %s3761_s11, 4 }
  0xdc   : > { %s452_s27 = scalar_lea.sflag (!%p4105_p8), [#allocation3], %s3761_s11  ;;  %s455_s28 = scalar_lea.vmem (!%p4105_p8), [#allocation2], %s3764_s15 }
  0xe2   : > { %3343 = dma.done.wait (%p4106_p10), %s452_s27, 256  }
  0xe3   : > { %3345 = vsyncadd (%p4106_p10), %s452_s27, 4294967040  ;;  %s460_s7 = sand.u32 1, %s3476_s21   ;;  %s464_s17 = scalar_lea.vmem [#allocation5], %s3764_s15 }
  0xe4   : > { %s461_s25 = scalar_lea.sflag [#allocation6], %s460_s7 }
  0xe5   : > { %3347 = dma.done.wait (%p4106_p10), %s461_s25, 512  }
  0xe6   : > { %3349 = vsyncadd (%p4106_p10), %s461_s25, 4294966784  ;;  %s473_s26 = scalar_lea.vmem [#allocation7], %s3764_s15  ;;  %p4107_p0 = scmp.eq.s32.totalorder %s3476_s21, 0 }
  0xe8   : > { %3351 = dma.done.wait (%p4107_p0), [#allocation9], 1024   ;;  %p4108_p1 = pmov %p4107_p0 }
  0xe9   : > { %p4109_p6 = pmov %p4107_p0 }
  0xea   : > { %3353 = vsyncadd (%p4108_p1), [#allocation9], 4294966272 }
  0xeb   : > { %3355 = dma.done.wait (%p4109_p6), [#allocation12], 528   ;;  %p4110_p3 = pmov %p4107_p0 }
  0xec   : > { %v639_v0 = vld [vmem:[#allocation10] sm:$0xff]  ;;  %v640_v1 = vld [vmem:[#allocation10 + $0x8] sm:$0xff]  ;;  %vm555_vm0 = vcmask 261120   ;;  %v641_v5 = vld [vmem:[#allocation10 + $0x10] sm:$0xff]  ;;  %v3387_v16 = vmov 0.0   ;;  %vm3388_vm1 = vmmov 0  }
  0xed   : > { %3357 = vsyncadd (%p4110_p3), [#allocation12], 4294966768  ;;  %v544_v2 = vld [vmem:[#allocation8] sm:$0xff]  ;;  %v2936_v3 = vpack.c.bf16 %v640_v1, %v639_v0  ;;  %v545_v4 = vld [vmem:[#allocation8 + $0x8] sm:$0xff]  ;;  %s4111_s3 = sld [smem:[#allocation28_spill]]  ;;  %vm825_vm2 = vcmask 64512  }
  0xee   : > { %v642_v6 = vld [vmem:[#allocation10 + $0x18] sm:$0xff]  ;;  %v2928_v7 = vpack.c.bf16 %v545_v4, %v544_v2  ;;  %v546_v9 = vld [vmem:[#allocation8 + $0x10] sm:$0xff]  ;;  %v2685_v17 = vld [vmem:[%s4041_s6] ss:$0 sm:$0xff]  ;;  %s3389_s1 = smov 120   ;;  %s3390_s13 = smov 112  }
  0xef   : > { %v2940_v8 = vpack.c.bf16 %v642_v6, %v641_v5  ;;  %v547_v10 = vld [vmem:[#allocation8 + $0x18] sm:$0xff]  ;;  %v637_v11 = vld [vmem:[%s464_s17] sm:$0xff]  ;;  %2937 = vmatprep.subr.bf16.mxu1 %v2936_v3  ;;  %v734_v28 = vld [vmem:[#allocation11 + $0x8] sm:$0xff]  ;;  %s3391_s14 = smov 104   ;;  %s4112_s12 = sld [smem:[#allocation30_spill]] }
  0xf0   : > { %v2932_v12 = vpack.c.bf16 %v547_v10, %v546_v9  ;;  %2814 = vmatprep.mubr.msk.f32.mxu1 %vm555_vm0, %v637_v11  ;;  %v542_v13 = vld [vmem:[%s455_s28] sm:$0xff]  ;;  %2939 = vmatpush3.bf16.msra.mxu1 %v2936_v3  ;;  %v638_v14 = vld [vmem:[%s464_s17 + $0x8] sm:$0xff]  ;;  %s4113_s7 = sld [smem:[#allocation24_spill]]  ;;  %s537_s25 = scalar_lea.vmem [#allocation14], %s3764_s15 }
  0xf1   : > { %2929 = vmatprep.subr.bf16.mxu0 %v2928_v7  ;;  %2941 = vmatprep.subr.bf16.mxu1 %v2940_v8  ;;  %v543_v15 = vld [vmem:[%s455_s28 + $0x8] sm:$0xff]  ;;  %v733_v27 = vld [vmem:[#allocation11] sm:$0xff]  ;;  %v735_v29 = vld [vmem:[#allocation11 + $0x10] sm:$0xff]  ;;  %s2503_s17 = sshll.u32 %s537_s25, 4  ;;  %s4114_s10 = sld [smem:[#allocation31_spill]]  ;;  %s3984_s17 = int_to_ptr.vmem [resolvable:$true] %s2503_s17 }
  0xf2   : > { %2931 = vmatpush3.bf16.msra.mxu0 %v2928_v7  ;;  %2803 = vmatprep.mubr.msk.f32.mxu0 %vm555_vm0, %v542_v13  ;;  %v2944_v30 = vpack.c.bf16 %v734_v28, %v733_v27  ;;  %v736_v31 = vld [vmem:[#allocation11 + $0x18] sm:$0xff]  ;;  %v731_v32 = vld [vmem:[%s473_s26] sm:$0xff]  ;;  %s2732_s24 = sshll.u32 %s3476_s21, 8  ;;  %s2490_s15 = scalar_lea.sflag [#allocation4], %s3761_s11 }
  0xf3   : > { %2933 = vmatprep.subr.bf16.mxu0 %v2932_v12  ;;  %v2682_v19 = vld [vmem:[%s4111_s3] ss:$0 sm:$0xff]  ;;  %v2948_v33 = vpack.c.bf16 %v736_v31, %v735_v29  ;;  %v732_v34 = vld [vmem:[%s473_s26 + $0x8] sm:$0xff]  ;;  %s3298_s21 = scalar_lea.vmem %s3984_s17, 256 }
  0xf4   : > { %2943 = vmatpush3.bf16.msra.mxu1 %v2940_v8  ;;  %v2688_v54 = vld [vmem:[#allocation13] ss:$0 sm:$0xff]  ;;  %p3299_p5 = scmp.ne.s32.totalorder %s3984_s17, %s3298_s21 }
  0xf5   : > { %2828 = vmatprep.subr.mxu1 %v3387_v16 }
  0xf6   : > { %2935 = vmatpush3.bf16.msra.mxu0 %v2932_v12  ;;  %p4116_p2 = scmp.ne.s32.totalorder %s4113_s7, 0 }
  0xf7   : > { %2815 = vmatmul.mubr.msk.f32.vlgmr.msra.gmra.mrb[0].mxu1 %vm555_vm0, %v638_v14  ;;  %2945 = vmatprep.subr.bf16.mxu0 %v2944_v30 }
  0xf8   : > { %2830 = vmatprep.mubr.msk.f32.mxu1 %vm3388_vm1, %v3387_v16  ;;  %p3300_p4 = pnand %p3299_p5, %p4116_p2 }
  0xf9   : > { %2804 = vmatmul.mubr.msk.f32.vlgmr.msra.gmra.mrb[0].mxu0 %vm555_vm0, %v543_v15 }
  0xfa   : > { %2825 = vmatprep.mubr.msk.f32.mxu0 %vm555_vm0, %v731_v32  ;;  %2947 = vmatpush3.bf16.msra.mxu0 %v2944_v30  ;;  %p3301_p11 = pneg %p3300_p4 }
  0xfb   : > { %2949 = vmatprep.subr.bf16.mxu0 %v2948_v33 }
  0xfe   : > { %2951 = vmatpush3.bf16.msra.mxu0 %v2948_v33 }
  0xff   : > { %2848 = vmatprep.subr.mxu0 %v3387_v16 }
 0x101   : > { %2826 = vmatmul.mubr.msk.f32.vlgmr.msra.gmra.mrb[2].mxu0 %vm555_vm0, %v732_v34 }
 0x102   : > { %2850 = vmatprep.mubr.msk.f32.mxu0 %vm3388_vm1, %v3387_v16 }
 0x1ca   : > { %v2816_v18 = vpop.f32.mrb[0].mxu1 }
 0x1cb   : > { %v722_v20 = vpop.f32.mrb[1].mxu1  ;;  %v3815_v25 = vadd.f32 %v2816_v18, %v2685_v17 }
 0x1cc   : > { %v2805_v21 = vpop.f32.mrb[0].mxu0  ;;  %v3808_v22 = vadd.f32 %v2685_v17, %v722_v20 }
 0x1cd   : > { %v628_v23 = vpop.f32.mrb[1].mxu0  ;;  %v3823_v26 = vadd.f32 %v2805_v21, %v2682_v19 }
 0x1ce   : > { %v3810_v24 = vadd.f32 %v2682_v19, %v628_v23  ;;  %2829 = vmatpush3.xpose.msk.msra.mxu1 %vm825_vm2, %v3808_v22 }
 0x1cf   : > { %2833 = vmatprep.subr.mxu1 %v3387_v16 }
 0x1d1   : > { %2831 = vmatmul.mubr.msk.f32.vlgmr.msra.gmra.mrb[2].mxu1 %vm825_vm2, %v3810_v24 }
 0x1d2   : > { %2834 = vmatpush3.xpose.msk.msra.mxu1 %vm825_vm2, %v3815_v25  ;;  %2835 = vmatprep.mubr.msk.f32.mxu1 %vm3388_vm1, %v3387_v16 }
 0x1d3   : > { %2838 = vmatprep.subr.mxu1 %v3387_v16 }
 0x1d4   : > { %v2827_v53 = vpop.f32.mrb[2].mxu0 }
 0x1d5   : > { %2836 = vmatmul.mubr.msk.f32.vlgmr.msra.gmra.mrb[4].mxu1 %vm825_vm2, %v3823_v26  ;;  %v816_v55 = vpop.f32.mrb[3].mxu0  ;;  %v3847_v56 = vadd.f32 %v2827_v53, %v2688_v54 }
 0x1d6   : > { %2840 = vmatprep.mubr.msk.f32.mxu1 %vm3388_vm1, %v3387_v16  ;;  %v3849_v57 = vadd.f32 %v2688_v54, %v816_v55 }
 0x1d8   : > { %2839 = vmatpush3.msra.mxu1 %v3849_v57 }
 0x1d9   : > { %2843 = vmatprep.subr.mxu1 %v3387_v16 }
 0x2a4   : > { %v898_v35 = vpop.f32.mrb[2].mxu1 }
 0x2a5   : > { %v978_v36 = vmul.f32 0.35355338, %v898_v35  ;;  %v2832_v37 = vpop.f32.mrb[3].mxu1 }
 0x2a7   : > { %v980_v38 = vsel %vm825_vm2, %v978_v36, -inf }
 0x2a8   : > { %981 = vmax.xlane.f32.xlu0 %v980_v38  ;;  %v974_v39 = vpop.f32.mrb[4].mxu1 }
 0x2a9   : > { %v979_v40 = vmul.f32 0.35355338, %v974_v39  ;;  %v2837_v41 = vpop.f32.mrb[5].mxu1 }
 0x2ab   : > { %v983_v42 = vsel %vm825_vm2, %v979_v40, -inf }
 0x2ac   : > { %984 = vmax.xlane.f32.xlu0 %v983_v42 }
 0x2c2   : > { %1229 = vrot.lane.b32.xlu0 %v3815_v25, %s3389_s1 }
 0x335   : > { %v982_v43 = vpop.xlane.xlu0 %981 }
 0x336   : > { %v986_v44 = vsub.f32 %v978_v36, %v982_v43 }
 0x338   : > { %v988_v45 = vmul.f32 1.442695, %v986_v44 }
 0x339   : > { %v985_v46 = vpop.xlane.xlu0 %984 }
 0x33a   : > { %3064 = vpow2.f32 %v988_v45  ;;  %v987_v47 = vsub.f32 %v979_v40, %v985_v46 }
 0x33c   : > { %v990_v48 = vmul.f32 1.442695, %v987_v47 }
 0x33d   : > { %v1230_v3 = vpop.permute.xlu0 %1229 }
 0x33e   : > { %3066 = vpow2.f32 %v990_v48 }
 0x344   : > { %v3065_v49 = vpop.eup %3064 }
 0x345   : > { %v992_v50 = vsel %vm825_vm2, %v3065_v49, 0.0 }
 0x346   : > { %993 = vadd.xlane.f32.xlu1 %v992_v50 }
 0x348   : > { %v3067_v51 = vpop.eup %3066 }
 0x349   : > { %v995_v52 = vsel %vm825_vm2, %v3067_v51, 0.0 }
 0x34a   : > { %996 = vadd.xlane.f32.xlu1 %v995_v52  ;;  %v1148_v52 = vld [vmem:[%s4112_s12] sm:$0xff] }
 0x35b   : > { %1227 = vrot.lane.b32.xlu1 %v3823_v26, %s3389_s1 }
 0x35f   : > { %1151 = vrot.lane.b32.xlu1 %v3808_v22, %s3389_s1 }
 0x363   : > { %1149 = vrot.lane.b32.xlu1 %v3810_v24, %s3389_s1 }
 0x367   : > { %1648 = vrot.lane.b32.xlu1 %v3808_v22, %s3390_s13 }
 0x3d3   : > { %v994_v58 = vpop.xlane.xlu1 %993 }
 0x3d4   : > { %3068 = vrcp.f32 %v994_v58 }
 0x3d7   : > { %v997_v59 = vpop.xlane.xlu1 %996 }
 0x3d8   : > { %3070 = vrcp.f32 %v997_v59 }
 0x3db   : > { %v1228_v60 = vpop.permute.xlu1 %1227 }
 0x3de   : > { %v3069_v61 = vpop.eup %3068 }
 0x3df   : > { %v1000_v62 = vmul.f32 %v3069_v61, %v3065_v49  ;;  %v1152_v63 = vpop.permute.xlu1 %1151 }
 0x3e0   : > { %2849 = vmatpush3.xpose.msk.msra.mxu0 %vm825_vm2, %v1152_v63 }
 0x3e1   : > { %2841 = vmatmul.mubr.msk.f32.vlgmr.msra.gmra.mrb[6].mxu1 %vm825_vm2, %v1000_v62  ;;  %2858 = vmatprep.subr.mxu0 %v3387_v16 }
 0x3e2   : > { %v3071_v0 = vpop.eup %3070  ;;  %2844 = vmatpush3.msra.mxu1 %v3847_v56  ;;  %2845 = vmatprep.mubr.msk.f32.mxu1 %vm3388_vm1, %v3387_v16 }
 0x3e3   : > { %v1001_v1 = vmul.f32 %v3071_v0, %v3067_v51  ;;  %v1150_v2 = vpop.permute.xlu1 %1149  ;;  %2853 = vmatprep.subr.mxu1 %v3387_v16  ;;  %v1483_v51 = vld [vmem:[%s4112_s12 + $0x8] sm:$0xff] }
 0x3e4   : > { %2851 = vmatmul.mubr.msk.f32.vlgmr.msra.gmra.mrb[4].mxu0 %vm825_vm2, %v1150_v2 }
 0x3e5   : > { %2846 = vmatmul.mubr.msk.f32.vlgmr.msra.gmra.mrb[8].mxu1 %vm825_vm2, %v1001_v1  ;;  %2860 = vmatprep.mubr.msk.f32.mxu0 %vm3388_vm1, %v3387_v16 }
 0x3e6   : > { %2855 = vmatprep.mubr.msk.f32.mxu1 %vm3388_vm1, %v3387_v16 }
 0x3e7   : > { %v1649_v27 = vpop.permute.xlu1 %1648 }
 0x3e9   : > { %2854 = vmatpush3.xpose.msk.msra.mxu1 %vm825_vm2, %v1230_v3 }
 0x3ea   : > { %2863 = vmatprep.subr.mxu1 %v3387_v16 }
 0x3ec   : > { %2856 = vmatmul.mubr.msk.f32.vlgmr.msra.gmra.mrb[10].mxu1 %vm825_vm2, %v1228_v60 }
 0x3ed   : > { %2865 = vmatprep.mubr.msk.f32.mxu1 %vm3388_vm1, %v3387_v16 }
 0x4b4   : > { %v3877_v4 = vpop.f32.mrb[6].mxu1 }
 0x4b5   : > { %v2842_v5 = vpop.f32.mrb[7].mxu1 }
 0x4b6   : > { %v1978_v5 = vld [vmem:[%s4112_s12 + $0x10] sm:$0xff] }
 0x4b7   : > { %v1223_v6 = vpop.f32.mrb[4].mxu0 }
 0x4b8   : > { %v3879_v7 = vpop.f32.mrb[8].mxu1  ;;  %v2852_v8 = vpop.f32.mrb[5].mxu0  ;;  %v1305_v21 = vmul.f32 0.35355338, %v1223_v6 }
 0x4b9   : > { %v2847_v9 = vpop.f32.mrb[9].mxu1 }
 0x4ba   : > { %v1307_v23 = vsel %vm825_vm2, %v1305_v21, -inf }
 0x4bf   : > { %v1301_v10 = vpop.f32.mrb[10].mxu1 }
 0x4c0   : > { %v1306_v11 = vmul.f32 0.35355338, %v1301_v10  ;;  %v2857_v12 = vpop.f32.mrb[11].mxu1 }
 0x4c2   : > { %v1310_v13 = vsel %vm825_vm2, %v1306_v11, -inf }
 0x4c3   : > { %1311 = vmax.xlane.f32.xlu0 %v1310_v13 }
 0x4d9   : > { %1407 = vrot.lane.b32.xlu0 %v3847_v56, %s3389_s1 }
 0x4dd   : > { %1646 = vrot.lane.b32.xlu0 %v3810_v24, %s3390_s13 }
 0x4e1   : > { %1724 = vrot.lane.b32.xlu0 %v3823_v26, %s3390_s13 }
 0x550   : > { %v1312_v14 = vpop.xlane.xlu0 %1311 }
 0x551   : > { %v1314_v15 = vsub.f32 %v1306_v11, %v1312_v14 }
 0x553   : > { %v1317_v17 = vmul.f32 1.442695, %v1314_v15 }
 0x554   : > { %v1408_v18 = vpop.permute.xlu0 %1407 }
 0x555   : > { %3072 = vpow2.f32 %v1317_v17  ;;  %2864 = vmatpush3.msra.mxu1 %v1408_v18 }
 0x556   : > { %2878 = vmatprep.subr.mxu1 %v3387_v16 }
 0x558   : > { %v1647_v31 = vpop.permute.xlu0 %1646 }
 0x55c   : > { %v1725_v33 = vpop.permute.xlu0 %1724 }
 0x55f   : > { %v3073_v19 = vpop.eup %3072 }
 0x560   : > { %v1322_v20 = vsel %vm825_vm2, %v3073_v19, 0.0 }
 0x561   : > { %1323 = vadd.xlane.f32.xlu1 %v1322_v20 }
 0x572   : > { %1726 = vrot.lane.b32.xlu1 %v3815_v25, %s3390_s13 }
 0x596   : > { %1308 = vmax.xlane.f32.xlu1 %v1307_v23 }
 0x5ee   : > { %v1324_v28 = vpop.xlane.xlu1 %1323 }
 0x5ef   : > { %3074 = vrcp.f32 %v1324_v28 }
 0x5f2   : > { %v1727_v32 = vpop.permute.xlu1 %1726 }
 0x5f9   : > { %v3075_v29 = vpop.eup %3074 }
 0x5fa   : > { %v1328_v30 = vmul.f32 %v3075_v29, %v3073_v19 }
 0x5fc   : > { %2866 = vmatmul.mubr.msk.f32.vlgmr.msra.gmra.mrb[12].mxu1 %vm825_vm2, %v1328_v30 }
 0x5fd   : > { %2879 = vmatpush3.xpose.msk.msra.mxu1 %vm825_vm2, %v1649_v27  ;;  %2880 = vmatprep.mubr.msk.f32.mxu1 %vm3388_vm1, %v3387_v16 }
 0x5fe   : > { %2883 = vmatprep.subr.mxu1 %v3387_v16 }
 0x600   : > { %2881 = vmatmul.mubr.msk.f32.vlgmr.msra.gmra.mrb[14].mxu1 %vm825_vm2, %v1647_v31 }
 0x601   : > { %2884 = vmatpush3.xpose.msk.msra.mxu1 %vm825_vm2, %v1727_v32  ;;  %2885 = vmatprep.mubr.msk.f32.mxu1 %vm3388_vm1, %v3387_v16 }
 0x602   : > { %2893 = vmatprep.subr.mxu1 %v3387_v16 }
 0x604   : > { %2886 = vmatmul.mubr.msk.f32.vlgmr.msra.gmra.mrb[16].mxu1 %vm825_vm2, %v1725_v33 }
 0x605   : > { %2895 = vmatprep.mubr.msk.f32.mxu1 %vm3388_vm1, %v3387_v16 }
 0x623   : > { %v1309_v34 = vpop.xlane.xlu1 %1308 }
 0x624   : > { %v1313_v35 = vsub.f32 %v1305_v21, %v1309_v34 }
 0x626   : > { %v1315_v36 = vmul.f32 1.442695, %v1313_v35 }
 0x628   : > { %3076 = vpow2.f32 %v1315_v36 }
 0x632   : > { %v3077_v37 = vpop.eup %3076 }
 0x633   : > { %v1319_v38 = vsel %vm825_vm2, %v3077_v37, 0.0 }
 0x634   : > { %1320 = vadd.xlane.f32.xlu0 %v1319_v38 }
 0x64a   : > { %1330 = vrot.lane.b32.xlu0 %v3849_v57, %s3389_s1  ;;  %s4115_s1 = sld [smem:[#allocation32_spill]] }
 0x64e   : > { %1902 = vrot.lane.b32.xlu0 %v3847_v56, %s3390_s13 }
 0x652   : > { %2064 = vrot.lane.b32.xlu0 %v3808_v22, %s3391_s14 }
 0x656   : > { %2142 = vrot.lane.b32.xlu0 %v3815_v25, %s3391_s14 }
 0x65a   : > { %2062 = vrot.lane.b32.xlu0 %v3810_v24, %s3391_s14 }
 0x6c1   : > { %v1321_v39 = vpop.xlane.xlu0 %1320 }
 0x6c2   : > { %3078 = vrcp.f32 %v1321_v39 }
 0x6c5   : > { %v1331_v40 = vpop.permute.xlu0 %1330 }
 0x6c6   : > { %2859 = vmatpush3.msra.mxu0 %v1331_v40 }
 0x6c7   : > { %2868 = vmatprep.subr.mxu0 %v1483_v51 }
 0x6c9   : > { %v1903_v41 = vpop.permute.xlu0 %1902 }
 0x6ca   : > { %2894 = vmatpush3.msra.mxu1 %v1903_v41 }
 0x6cb   : > { %2903 = vmatprep.subr.mxu1 %v3387_v16 }
 0x6cc   : > { %v3079_v42 = vpop.eup %3078 }
 0x6cd   : > { %v1327_v43 = vmul.f32 %v3079_v42, %v3077_v37  ;;  %v2065_v8 = vpop.permute.xlu0 %2064 }
 0x6cf   : > { %2861 = vmatmul.mubr.msk.f32.vlgmr.msra.gmra.mrb[6].mxu0 %vm825_vm2, %v1327_v43  ;;  %v1479_v44 = vpop.f32.mrb[12].mxu1 }
 0x6d0   : > { %v2867_v22 = vpop.f32.mrb[13].mxu1  ;;  %2869 = vmatpush3.msra.mxu0 %v1483_v51 }
 0x6d1   : > { %2873 = vmatprep.subr.mxu0 %v1148_v52  ;;  %v2143_v10 = vpop.permute.xlu0 %2142 }
 0x6d3   : > { %v1720_v45 = vpop.f32.mrb[14].mxu1 }
 0x6d4   : > { %v1802_v46 = vmul.f32 0.35355338, %v1720_v45  ;;  %v2882_v25 = vpop.f32.mrb[15].mxu1 }
 0x6d5   : > { %v2063_v12 = vpop.permute.xlu0 %2062 }
 0x6d6   : > { %v1804_v47 = vsel %vm825_vm2, %v1802_v46, -inf }
 0x6d7   : > { %1805 = vmax.xlane.f32.xlu1 %v1804_v47  ;;  %v1798_v24 = vpop.f32.mrb[16].mxu1 }
 0x6d8   : > { %v1803_v48 = vmul.f32 0.35355338, %v1798_v24  ;;  %v2887_v49 = vpop.f32.mrb[17].mxu1 }
 0x6da   : > { %v1807_v50 = vsel %vm825_vm2, %v1803_v48, -inf }
 0x6db   : > { %1808 = vmax.xlane.f32.xlu1 %v1807_v50 }
 0x764   : > { %v1806_v53 = vpop.xlane.xlu1 %1805 }
 0x765   : > { %v1810_v54 = vsub.f32 %v1802_v46, %v1806_v53 }
 0x767   : > { %v1812_v55 = vmul.f32 1.442695, %v1810_v54 }
 0x768   : > { %v1809_v58 = vpop.xlane.xlu1 %1808 }
 0x769   : > { %3080 = vpow2.f32 %v1812_v55  ;;  %v1811_v59 = vsub.f32 %v1803_v48, %v1809_v58  ;;  %v2723_v48 = vld [vmem:[%s4114_s10] ss:$0 sm:$0xff] }
 0x76b   : > { %v1814_v60 = vmul.f32 1.442695, %v1811_v59 }
 0x76d   : > { %3082 = vpow2.f32 %v1814_v60 }
 0x773   : > { %v3081_v61 = vpop.eup %3080 }
 0x774   : > { %v1816_v62 = vsel %vm825_vm2, %v3081_v61, 0.0 }
 0x775   : > { %1817 = vadd.xlane.f32.xlu1 %v1816_v62 }
 0x777   : > { %v3083_v63 = vpop.eup %3082 }
 0x778   : > { %v1819_v0 = vsel %vm825_vm2, %v3083_v63, 0.0 }
 0x779   : > { %1820 = vadd.xlane.f32.xlu1 %v1819_v0 }
 0x78a   : > { %1826 = vrot.lane.b32.xlu1 %v3849_v57, %s3390_s13  ;;  %s3989_s13 = scalar_lea.hbm %s4115_s1, %s2732_s24 }
 0x78e   : > { %2140 = vrot.lane.b32.xlu1 %v3823_v26, %s3391_s14 }
 0x7a2   : > { %v1402_v1 = vpop.f32.mrb[6].mxu0 }
 0x7a3   : > { %v2862_v2 = vpop.f32.mrb[7].mxu0  ;;  %2870 = vmatprep.mubr.msk.f32.mxu0 %vm825_vm2, %v1402_v1 }
 0x7a4   : > { %2871 = vmatmul.mubr.msk.f32.vlgmr.msra.gmra.mrb[8].mxu0 %vm825_vm2, %v1479_v44 }
 0x7a5   : > { %2875 = vmatprep.mubr.msk.f32.mxu0 %vm825_vm2, %v3877_v4  ;;  %2874 = vmatpush3.msra.mxu0 %v1148_v52 }
 0x7a6   : > { %2888 = vmatprep.subr.mxu0 %v3387_v16 }
 0x7ac   : > { %2876 = vmatmul.mubr.msk.f32.vlgmr.msra.gmra.mrb[8].mxu0 %vm825_vm2, %v3879_v7 }
 0x7ad   : > { %2890 = vmatprep.mubr.msk.f32.mxu0 %vm3388_vm1, %v3387_v16 }
 0x802   : > { %v1818_v3 = vpop.xlane.xlu1 %1817 }
 0x803   : > { %3084 = vrcp.f32 %v1818_v3 }
 0x806   : > { %v1821_v26 = vpop.xlane.xlu1 %1820 }
 0x807   : > { %3086 = vrcp.f32 %v1821_v26 }
 0x80a   : > { %v1827_v6 = vpop.permute.xlu1 %1826 }
 0x80b   : > { %2889 = vmatpush3.msra.mxu0 %v1827_v6 }
 0x80c   : > { %2898 = vmatprep.subr.mxu0 %v1978_v5 }
 0x80d   : > { %v3085_v4 = vpop.eup %3084 }
 0x80e   : > { %v1824_v9 = vmul.f32 %v3085_v4, %v3081_v61  ;;  %v2141_v18 = vpop.permute.xlu1 %2140 }
 0x810   : > { %2891 = vmatmul.mubr.msk.f32.vlgmr.msra.gmra.mrb[10].mxu0 %vm825_vm2, %v1824_v9 }
 0x811   : > { %v3087_v7 = vpop.eup %3086  ;;  %2899 = vmatpush3.msra.mxu0 %v1978_v5 }
 0x812   : > { %v1825_v11 = vmul.f32 %v3087_v7, %v3083_v63  ;;  %2908 = vmatprep.subr.mxu0 %v3387_v16 }
 0x814   : > { %2896 = vmatmul.mubr.msk.f32.vlgmr.msra.gmra.mrb[18].mxu1 %vm825_vm2, %v1825_v11 }
 0x815   : > { %2904 = vmatpush3.xpose.msk.msra.mxu1 %vm825_vm2, %v2065_v8  ;;  %2905 = vmatprep.mubr.msk.f32.mxu1 %vm3388_vm1, %v3387_v16 }
 0x816   : > { %2913 = vmatprep.subr.mxu1 %v3387_v16 }
 0x818   : > { %2906 = vmatmul.mubr.msk.f32.vlgmr.msra.gmra.mrb[20].mxu1 %vm825_vm2, %v2063_v12 }
 0x819   : > { %2915 = vmatprep.mubr.msk.f32.mxu1 %vm3388_vm1, %v3387_v16 }
 0x8e3   : > { %v1898_v13 = vpop.f32.mrb[10].mxu0 }
 0x8e4   : > { %v2892_v14 = vpop.f32.mrb[11].mxu0  ;;  %2900 = vmatprep.mubr.msk.f32.mxu0 %vm825_vm2, %v1898_v13 }
 0x8e7   : > { %v1974_v15 = vpop.f32.mrb[18].mxu1 }
 0x8e8   : > { %v2897_v17 = vpop.f32.mrb[19].mxu1  ;;  %2901 = vmatmul.mubr.msk.f32.vlgmr.msra.gmra.mrb[8].mxu0 %vm825_vm2, %v1974_v15 }
 0x8e9   : > { %2909 = vmatpush3.xpose.msk.msra.mxu0 %vm825_vm2, %v2143_v10  ;;  %2910 = vmatprep.mubr.msk.f32.mxu0 %vm3388_vm1, %v3387_v16 }
 0x8ea   : > { %2918 = vmatprep.subr.mxu0 %v3387_v16 }
 0x8eb   : > { %v2136_v19 = vpop.f32.mrb[20].mxu1 }
 0x8ec   : > { %v2218_v20 = vmul.f32 0.35355338, %v2136_v19  ;;  %v2907_v21 = vpop.f32.mrb[21].mxu1  ;;  %2911 = vmatmul.mubr.msk.f32.vlgmr.msra.gmra.mrb[12].mxu0 %vm825_vm2, %v2141_v18 }
 0x8ed   : > { %2920 = vmatprep.mubr.msk.f32.mxu0 %vm3388_vm1, %v3387_v16 }
 0x8ee   : > { %v2220_v23 = vsel %vm825_vm2, %v2218_v20, -inf }
 0x8ef   : > { %2221 = vmax.xlane.f32.xlu0 %v2220_v23 }
 0x97c   : > { %v2222_v27 = vpop.xlane.xlu0 %2221 }
 0x97d   : > { %v2226_v28 = vsub.f32 %v2218_v20, %v2222_v27 }
 0x97f   : > { %v2228_v29 = vmul.f32 1.442695, %v2226_v28 }
 0x981   : > { %3088 = vpow2.f32 %v2228_v29 }
 0x98b   : > { %v3089_v30 = vpop.eup %3088 }
 0x98c   : > { %v2232_v31 = vsel %vm825_vm2, %v3089_v30, 0.0 }
 0x98d   : > { %2233 = vadd.xlane.f32.xlu0 %v2232_v31 }
 0x9bf   : > { %v2214_v32 = vpop.f32.mrb[12].mxu0 }
 0x9c0   : > { %v2219_v33 = vmul.f32 0.35355338, %v2214_v32  ;;  %v2912_v34 = vpop.f32.mrb[13].mxu0 }
 0x9c2   : > { %v2223_v35 = vsel %vm825_vm2, %v2219_v33, -inf }
 0x9c3   : > { %2224 = vmax.xlane.f32.xlu1 %v2223_v35 }
 0x9d4   : > { %2318 = vrot.lane.b32.xlu1 %v3847_v56, %s3391_s14 }
 0xa1a   : > { %v2234_v41 = vpop.xlane.xlu0 %2233 }
 0xa50   : > { %v2225_v16 = vpop.xlane.xlu1 %2224 }
 0xa51   : > { %v2227_v36 = vsub.f32 %v2219_v33, %v2225_v16 }
 0xa53   : > { %v2230_v37 = vmul.f32 1.442695, %v2227_v36 }
 0xa54   : > { %v2319_v38 = vpop.permute.xlu1 %2318 }
 0xa55   : > { %3090 = vpow2.f32 %v2230_v37  ;;  %2919 = vmatpush3.msra.mxu0 %v2319_v38 }
 0xa56   : > { %3092 = vrcp.f32 %v2234_v41 }
 0xa5f   : > { %v3091_v39 = vpop.eup %3090 }
 0xa60   : > { %v2235_v40 = vsel %vm825_vm2, %v3091_v39, 0.0  ;;  %v3093_v43 = vpop.eup %3092 }
 0xa61   : > { %2236 = vadd.xlane.f32.xlu0 %v2235_v40  ;;  %v2240_v44 = vmul.f32 %v3093_v43, %v3089_v30 }
 0xa77   : > { %2242 = vrot.lane.b32.xlu0 %v3849_v57, %s3391_s14  ;;  %v2394_v57 = vld [vmem:[%s4112_s12 + $0x18] sm:$0xff]  ;;  %s3392_s14 = smov [#allocation14]  }
 0xa78   : > { %2923 = vmatprep.subr.mxu0 %v2394_v57  ;;  %s3302_s9 = sshll.u32 %s3392_s14, 4  ;;  %s3303_s9 = int_to_ptr.vmem [resolvable:$false] %s3302_s9 }
 0xa79   : > { %s3304_s29 = scalar_lea.vmem %s3303_s9, 512  ;;  %p3305_p13 = scmp.lt.s32.totalorder %s3984_s17, %s3303_s9 }
 0xa7a   : > { %p3306_p7 = scmp.lt.s32.totalorder %s3304_s29, %s3298_s21 }
 0xa7c   : > { %p3307_p9 = por %p3306_p7, %p3305_p13 }
 0xa7e   : > { %p3308_p12 = pnand %p3307_p9, %p3301_p11 }
 0xaee   : > { %v2237_v42 = vpop.xlane.xlu0 %2236 }
 0xaef   : > { %3094 = vrcp.f32 %v2237_v42 }
 0xaf2   : > { %v2243_v56 = vpop.permute.xlu0 %2242 }
 0xaf3   : > { %2914 = vmatpush3.msra.mxu1 %v2243_v56 }
 0xaf4   : > { %2916 = vmatmul.mubr.msk.f32.vlgmr.msra.gmra.mrb[22].mxu1 %vm825_vm2, %v2240_v44 }
 0xaf9   : > { %v3095_v22 = vpop.eup %3094 }
 0xafa   : > { %v2241_v45 = vmul.f32 %v3095_v22, %v3091_v39 }
 0xafc   : > { %2921 = vmatmul.mubr.msk.f32.vlgmr.msra.gmra.mrb[14].mxu0 %vm825_vm2, %v2241_v45 }
 0xafd   : > { %2924 = vmatpush3.msra.mxu0 %v2394_v57 }
 0xbc7   : > { %v2314_v46 = vpop.f32.mrb[22].mxu1 }
 0xbc8   : > { %v2917_v25 = vpop.f32.mrb[23].mxu1  ;;  %2925 = vmatprep.mubr.msk.f32.mxu0 %vm825_vm2, %v2314_v46 }
 0xbcf   : > { %v2390_v47 = vpop.f32.mrb[14].mxu0 }
 0xbd0   : > { %v2922_v24 = vpop.f32.mrb[15].mxu0  ;;  %2926 = vmatmul.mubr.msk.f32.vlgmr.msra.gmra.mrb[8].mxu0 %vm825_vm2, %v2390_v47 }
 0xca3   : > { %v2927_v49 = vpop.f32.mrb[8].mxu0 }
 0xca4   : > { %v2486_v50 = vadd.f32 %v2927_v49, %v2723_v48  ;;  %v2467_v51 = vpop.f32.mrb[9].mxu0 }
 0xca5   : > { %v2485_v52 = vadd.f32 %v2723_v48, %v2467_v51 }
 0xca6   : > { %2488 = vst.msk [vmem:[%s537_s25 + $0x8] sm:$0xff] %vm555_vm0, %v2486_v50 }
 0xca7   : > { %2487 = vst.msk [vmem:[%s537_s25] sm:$0xff] %vm555_vm0, %v2485_v52 }
 0xca8   : > { %3311 = shalt.err (!%p3308_p12)
}
 0xca9   : > { %s3312_s30 = scalar_lea.hbm %s3989_s13, 256  ;;  %s3316_s22 = scalar_lea.hbm %s4115_s1, 512 }
 0xcaa   : > { %p3313_p8 = scmp.ne.s32.totalorder %s3989_s13, %s3312_s30  ;;  %p3317_p1 = scmp.lt.u32.totalorder %s3989_s13, %s4115_s1 }
 0xcab   : > { %p3318_p6 = scmp.lt.u32.totalorder %s3316_s22, %s3312_s30  ;;  %p3320_p5 = scmp.lt.u32.totalorder %s3312_s30, %s3989_s13 }
 0xcac   : > { %p3314_p10 = pnand %p3313_p8, %p4116_p2 }
 0xcad   : > { %p3319_p3 = por %p3318_p6, %p3317_p1 }
 0xcae   : > { %p3315_p0 = pneg %p3314_p10 }
 0xcaf   : > { %p3321_p4 = por %p3320_p5, %p3319_p3 }
 0xcb1   : > { %p3322_p11 = pnand %p3321_p4, %p3315_p0 }
 0xcb3   : > { %3325 = shalt.err (!%p3322_p11)
}
 0xcb4   : > { %s3393_s25 = smov 128   ;;  %s3394_s26 = smov 8  }
 0xcb5   : > { %2980 = dma.vmem_to_hbm [thread:$0]  (%p4116_p2), %s3984_s17, 256, %s3989_s13, %s2490_s15, %s3393_s25, %s3393_s25, %s3394_s26  }
 0xcb6 PF: > { %s4117_s23 = sld [smem:[#allocation20_spill]]  ;;  %s4118_s10 = sld [smem:[#allocation22_spill]] }
 0xcb7   : > { %s4119_s24 = sld [smem:[#allocation21_spill]] }
 0xcbc   : > { %s2518_s20 = sand.u32 1, %s4117_s23   ;;  %p4120_p13 = scmp.ne.s32.totalorder %s4118_s10, 0 }
 0xcbd   : > { %p4121_p7 = scmp.ge.s32.totalorder %s4119_s24, 2  ;;  %s2519_s3 = scalar_lea.sflag [#allocation4], %s2518_s20 }
 0xcbf   : > { %p3006_p9 = pnand %p4121_p7, %p4120_p13 }
 0xcc1   : > { %3359 = dma.done.wait (!%p3006_p9), %s2519_s3, 256  }
 0xcc2   : > { %3361 = vsyncadd (!%p3006_p9), %s2519_s3, 4294967040  ;;  %s4122_s20 = sld [smem:[#allocation23_spill]]  ;;  %s4123_s21 = sld [smem:[#allocation25_spill]] }
 0xcc3   : > { %s4124_s17 = smov %s3368_s18  ;;  %s4125_s18 = smov %s3372_s19 }
 0xcc8   : > { %p29_p12 = scmp.ge.s32.totalorder %s4122_s20, 4   ;;  %s4126_s19 = smov %s4123_s21 }
 0xcca   :  { %31 = sbr.rel (!%p29_p12) target bundleno = 17 (0x11), region = 149 }
 0xcd1   :  { %2524 = vsyncpa [#allocation3], 1 }
 0xcd2   :  { %2526 = vsyncpa [#allocation3 + $0x1], 1 }
 0xcd3   :  { %2527 = vsyncpa [#allocation6], 1 }
 0xcd4   :  { %2529 = vsyncpa [#allocation6 + $0x1], 1 }
 0xcd5   :  { %2530 = vsyncpa [#allocation9], 1 }
 0xcd6   :  { %2531 = vsyncpa [#allocation12], 1 }
 0xcd7   :  { %2532 = vsyncpa [#allocation4], 1 }
 0xcd8   :  { %2534 = vsyncpa [#allocation4 + $0x1], 1 }

</bundles_post_ra>
